<compile_context>
chip_gen: v7x
topology: tpu7x:2x2x1
jax: 0.10.0
libtpu: 0.0.40
codegen_flags: <defaults>
</compile_context>

<pallas_src>
import functools
import math

import jax
import jax.numpy as jnp
from jax.experimental import pallas as pl
from jax.experimental.pallas import tpu as pltpu


def _attention_and_output(qp, kp, vp, wo_ref, bo_ref, o_ref, head_out_ref,
                          num_heads):
    """Per-head attention + single fused output projection.

    qp/kp/vp: (nb, L, E) projected activations in the input dtype (the
    1/sqrt(head_dim) scale is already folded into the query weight).  Each
    head's output lands in the VMEM scratch `head_out_ref` (nb*Lq, E) at lane
    offset h*d; a single (nb*Lq, E) @ (E, E) matmul then produces fc_out.
    """
    nb, lq, e = qp.shape
    _, lk, _ = kp.shape
    d = e // num_heads
    in_dtype = qp.dtype

    # TODO(synk): for production key lengths / many heads, convert this static
    #             loop to flash-style (tq, tk) tiling with online softmax and a
    #             kv grid axis; also prefer E / head_dim that are 128-aligned so
    #             the lane slices below are whole-lane-tile ops (demo E=32).
    for h in range(num_heads):
        lo = h * d
        qh = qp[:, :, lo:lo + d]          # (nb, lq, d)
        kh = kp[:, :, lo:lo + d]          # (nb, lk, d)
        vh = vp[:, :, lo:lo + d]          # (nb, lk, d)

        s = jnp.einsum('bqd,bkd->bqk', qh, kh,
                       preferred_element_type=jnp.float32)
        # TODO(synk): atten_mask path (masked_fill with -inf) not implemented;
        #             the module's default forward uses atten_mask=None.
        m = jnp.max(s, axis=-1, keepdims=True)
        p = jnp.exp(s - m)
        l = jnp.sum(p, axis=-1, keepdims=True)
        # TODO(synk): dropout_p > 0 not implemented (module default 0.0).

        # Unnormalized PV matmul; normalization deferred to the f32 output.
        oh = jnp.einsum('bqk,bkd->bqd', p.astype(in_dtype), vh,
                        preferred_element_type=jnp.float32)
        oh = oh * pl.reciprocal(l, approx=True)          # EUP slot, not VPU div

        head_out_ref[:, lo:lo + d] = oh.reshape(nb * lq, d).astype(in_dtype)

    # ONE K=E output-projection matmul (MXU-friendly contraction) + fc_out bias.
    out = jnp.dot(head_out_ref[...], wo_ref[...],
                  preferred_element_type=jnp.float32) + bo_ref[...]
    o_ref[...] = out.reshape(nb, lq, e).astype(o_ref.dtype)


def mha_self_kernel(x_ref, wqkv_ref, wo_ref, bo_ref, o_ref, head_out_ref, *,
                    num_heads):
    """Self-attention: one fused (nb*L, E) @ (E, 3E) QKV projection."""
    nb, l, e = x_ref.shape
    in_dtype = x_ref.dtype
    x2 = x_ref[...].reshape(nb * l, e)
    qkv = jnp.dot(x2, wqkv_ref[...],
                  preferred_element_type=jnp.float32).astype(in_dtype)
    qp = qkv[:, 0 * e:1 * e].reshape(nb, l, e)
    kp = qkv[:, 1 * e:2 * e].reshape(nb, l, e)
    vp = qkv[:, 2 * e:3 * e].reshape(nb, l, e)
    _attention_and_output(qp, kp, vp, wo_ref, bo_ref, o_ref, head_out_ref,
                          num_heads)


def mha_cross_kernel(q_ref, k_ref, v_ref, wqkv_ref, wo_ref, bo_ref, o_ref,
                     head_out_ref, *, num_heads):
    """Cross-attention: distinct activations, single fused-weight DMA stream."""
    nb, lq, e = q_ref.shape
    _, lk, _ = k_ref.shape
    in_dtype = q_ref.dtype
    wqkv = wqkv_ref[...]                                  # (E, 3E)
    q2 = q_ref[...].reshape(nb * lq, e)
    k2 = k_ref[...].reshape(nb * lk, e)
    v2 = v_ref[...].reshape(nb * lk, e)
    qp = jnp.dot(q2, wqkv[:, 0 * e:1 * e],
                 preferred_element_type=jnp.float32).astype(in_dtype).reshape(nb, lq, e)
    kp = jnp.dot(k2, wqkv[:, 1 * e:2 * e],
                 preferred_element_type=jnp.float32).astype(in_dtype).reshape(nb, lk, e)
    vp = jnp.dot(v2, wqkv[:, 2 * e:3 * e],
                 preferred_element_type=jnp.float32).astype(in_dtype).reshape(nb, lk, e)
    _attention_and_output(qp, kp, vp, wo_ref, bo_ref, o_ref, head_out_ref,
                          num_heads)


def prepare_params(params, num_heads):
    """One-time (parameter-init-time) preparation — NOT per call.

    nn.Linear weights (out, in) -> (in, out); Wq/Wk/Wv fused into (E, 3E) with
    1/sqrt(head_dim) folded into the Wq slice; bias reshaped to (1, E) f32.
    """
    wq, wk, wv, wo, bo = params
    e = wq.shape[0]
    d = e // num_heads
    scale = 1.0 / math.sqrt(d)
    wqkv_t = jnp.concatenate([wq.T * scale, wk.T, wv.T], axis=1)   # (E, 3E)
    wo_t = wo.T                                                    # (E, E)
    bo2 = bo.reshape(1, e).astype(jnp.float32)
    return wqkv_t, wo_t, bo2


def multi_head_attention(queries, keys, values, prepared_params, num_heads,
                         block_n=None):
    """queries/keys/values: (N, L, E).  prepared_params = prepare_params(...)."""
    wqkv_t, wo_t, bo2 = prepared_params
    N, Lq, E = queries.shape
    _, Lk, _ = keys.shape
    _, Lv, _ = values.shape
    assert Lk == Lv, "key_len must equal value_len"
    assert E % num_heads == 0, "embed_size must be divisible by num_heads"

    if block_n is None:
        # >=2 grid steps: lets v7x shard the batch axis across its two
        # TensorCores and gives BlockSpec double-buffering real DMA overlap.
        block_n = N // 2 if (N >= 2 and N % 2 == 0) else N
    assert N % block_n == 0
    grid = (N // block_n,)

    self_attn = (queries is keys) and (keys is values)

    # Explicit per-step VMEM budget (v7x: 64 MiB physical / 32 MiB default).
    itemsize = queries.dtype.itemsize
    seq_bytes = block_n * ((Lq if self_attn else Lq + 2 * Lk) * E) * itemsize
    out_bytes = block_n * Lq * E * itemsize
    w_bytes = (3 * E * E + E * E + E) * itemsize
    scratch_bytes = block_n * Lq * E * itemsize
    inter_bytes = 4 * block_n * (Lq * Lk + 3 * max(Lq, Lk) * E + 2 * Lq * E)
    est = 2 * (seq_bytes + out_bytes + w_bytes) + scratch_bytes + inter_bytes
    vmem_limit = int(min(max(2 * est, 4 * 1024 * 1024), 32 * 1024 * 1024))
    # TODO(synk): at production Lk, switch the attention body to flash-style
    #             (tq, tk) tiling so VMEM scales with tq*tk instead of Lq*Lk,
    #             and sweep pl.Buffered(3) on the K/V BlockSpecs on v6e.

    def seq_spec(L):
        return pl.BlockSpec((block_n, L, E), lambda n: (n, 0, 0))

    wqkv_spec = pl.BlockSpec((E, 3 * E), lambda n: (0, 0))
    wo_spec = pl.BlockSpec((E, E), lambda n: (0, 0))
    b_spec = pl.BlockSpec((1, E), lambda n: (0, 0))

    if self_attn:
        kern = functools.partial(mha_self_kernel, num_heads=num_heads)
        in_specs = [seq_spec(Lq), wqkv_spec, wo_spec, b_spec]
        args = (queries, wqkv_t, wo_t, bo2)
    else:
        kern = functools.partial(mha_cross_kernel, num_heads=num_heads)
        in_specs = [seq_spec(Lq), seq_spec(Lk), seq_spec(Lk),
                    wqkv_spec, wo_spec, b_spec]
        args = (queries, keys, values, wqkv_t, wo_t, bo2)

    return pl.pallas_call(
        kern,
        out_shape=jax.ShapeDtypeStruct((N, Lq, E), queries.dtype),
        grid_spec=pltpu.PrefetchScalarGridSpec(
            num_scalar_prefetch=0,
            grid=grid,
            in_specs=in_specs,
            out_specs=seq_spec(Lq),
            scratch_shapes=[pltpu.VMEM((block_n * Lq, E), queries.dtype)],
        ),
        compiler_params=pltpu.CompilerParams(
            dimension_semantics=("parallel",),
            vmem_limit_bytes=vmem_limit,
        ),
    )(*args)


def _reference(queries, keys, values, params, num_heads):
    """Pure-JAX reference reproducing the PyTorch forward semantics."""
    wq, wk, wv, wo, bo = params
    q = queries @ wq.T
    k = keys @ wk.T
    v = values @ wv.T
    N, Lq, E = q.shape
    _, Lk, _ = k.shape
    D = E // num_heads
    qh = q.reshape(N, Lq, num_heads, D)
    kh = k.reshape(N, Lk, num_heads, D)
    vh = v.reshape(N, Lk, num_heads, D)
    energy = jnp.einsum('nqhd,nkhd->nhqk', qh, kh)
    attn = jax.nn.softmax(energy / math.sqrt(D), axis=3)
    out = jnp.einsum('nhql,nlhd->nqhd', attn, vh).reshape(N, Lq, E)
    return out @ wo.T + bo


if __name__ == "__main__":
    N, L, E, H = 2, 8, 32, 4

    key = jax.random.PRNGKey(0)
    kq, kk, kv, kwq, kwk, kwv, kwo, kbo = jax.random.split(key, 8)

    queries = jax.random.normal(kq, (N, L, E), dtype=jnp.float32)
    keys_ = jax.random.normal(kk, (N, L, E), dtype=jnp.float32)
    values = jax.random.normal(kv, (N, L, E), dtype=jnp.float32)

    # nn.Linear-style deterministic init
    bound = 1.0 / math.sqrt(E)
    wq = jax.random.uniform(kwq, (E, E), minval=-bound, maxval=bound, dtype=jnp.float32)
    wk = jax.random.uniform(kwk, (E, E), minval=-bound, maxval=bound, dtype=jnp.float32)
    wv = jax.random.uniform(kwv, (E, E), minval=-bound, maxval=bound, dtype=jnp.float32)
    wo = jax.random.uniform(kwo, (E, E), minval=-bound, maxval=bound, dtype=jnp.float32)
    bo = jax.random.uniform(kbo, (E,), minval=-bound, maxval=bound, dtype=jnp.float32)
    params = (wq, wk, wv, wo, bo)

    # One-time parameter preparation (init-time, not per-call).
    prepared = prepare_params(params, H)

    # Cross-attention path (distinct q/k/v, general module forward).
    out = multi_head_attention(queries, keys_, values, prepared, num_heads=H)
    out = jax.block_until_ready(out)
    ref = _reference(queries, keys_, values, params, num_heads=H)
    assert out.shape == (N, L, E)
    # Tolerance is modest because the softmax denominator uses the EUP
    # approximate reciprocal (pl.reciprocal(..., approx=True)).
    assert jnp.allclose(out, ref, atol=1e-2, rtol=1e-2), "cross-attn mismatch"

    # Self-attention path (q is k is v) exercises the fused (E, 3E) QKV matmul.
    out_s = multi_head_attention(queries, queries, queries, prepared, num_heads=H)
    out_s = jax.block_until_ready(out_s)
    ref_s = _reference(queries, queries, queries, params, num_heads=H)
    assert jnp.allclose(out_s, ref_s, atol=1e-2, rtol=1e-2), "self-attn mismatch"

    print("KERNEL_OK")
</pallas_src>

<mosaic_0001>
module attributes {stable_mosaic.version = 11 : i64} {
  func.func @mha_cross_kernel(%arg0: i32, %arg1: memref<1x8x32xf32, #tpu.memory_space<vmem>>, %arg2: memref<1x8x32xf32, #tpu.memory_space<vmem>>, %arg3: memref<1x8x32xf32, #tpu.memory_space<vmem>>, %arg4: memref<32x96xf32, #tpu.memory_space<vmem>>, %arg5: memref<32x32xf32, #tpu.memory_space<vmem>>, %arg6: memref<1x32xf32, #tpu.memory_space<vmem>>, %arg7: memref<1x8x32xf32, #tpu.memory_space<vmem>>, %arg8: memref<8x32xf32, #tpu.memory_space<vmem>>) attributes {dimension_semantics = [#tpu.dimension_semantics<parallel>], iteration_bounds = array<i64: 2>, scalar_prefetch = 0 : i64, scratch_operands = 1 : i64, tpu.core_type = #tpu.core_type<tc>, window_params = [{transform_indices = @transform_0, window_bounds = array<i64: 1, 8, 32>}, {transform_indices = @transform_1, window_bounds = array<i64: 1, 8, 32>}, {transform_indices = @transform_2, window_bounds = array<i64: 1, 8, 32>}, {pipeline_mode = #tpu.pipeline_mode<synchronous>, transform_indices = @transform_3, window_bounds = array<i64: 32, 96>}, {pipeline_mode = #tpu.pipeline_mode<synchronous>, transform_indices = @transform_4, window_bounds = array<i64: 32, 32>}, {pipeline_mode = #tpu.pipeline_mode<synchronous>, transform_indices = @transform_5, window_bounds = array<i64: 1, 32>}, {transform_indices = @transform_6, window_bounds = array<i64: 1, 8, 32>}]} {
    %c0 = arith.constant 0 : index
    %c0_0 = arith.constant 0 : index
    %0 = vector.load %arg4[%c0, %c0_0] : memref<32x96xf32, #tpu.memory_space<vmem>>, vector<32x96xf32>
    %c0_1 = arith.constant 0 : index
    %c0_2 = arith.constant 0 : index
    %c0_3 = arith.constant 0 : index
    %1 = vector.load %arg1[%c0_1, %c0_2, %c0_3] : memref<1x8x32xf32, #tpu.memory_space<vmem>>, vector<1x8x32xf32>
    %2 = vector.shape_cast %1 : vector<1x8x32xf32> to vector<8x32xf32>
    %c0_4 = arith.constant 0 : index
    %c0_5 = arith.constant 0 : index
    %c0_6 = arith.constant 0 : index
    %3 = vector.load %arg2[%c0_4, %c0_5, %c0_6] : memref<1x8x32xf32, #tpu.memory_space<vmem>>, vector<1x8x32xf32>
    %4 = vector.shape_cast %3 : vector<1x8x32xf32> to vector<8x32xf32>
    %c0_7 = arith.constant 0 : index
    %c0_8 = arith.constant 0 : index
    %c0_9 = arith.constant 0 : index
    %5 = vector.load %arg3[%c0_7, %c0_8, %c0_9] : memref<1x8x32xf32, #tpu.memory_space<vmem>>, vector<1x8x32xf32>
    %6 = vector.shape_cast %5 : vector<1x8x32xf32> to vector<8x32xf32>
    %7 = vector.extract_strided_slice %0 {offsets = [0, 0], sizes = [32, 32], strides = [1, 1]} : vector<32x96xf32> to vector<32x32xf32>
    %cst = arith.constant dense<0.000000e+00> : vector<8x32xf32>
    %8 = tpu.matmul %2, %7, %cst {dimension_numbers = #tpu.dot_dimension_numbers<[1], [0], [0], [1], [0, 0, 1, 1], [], []>} : vector<8x32xf32>, vector<32x32xf32>, vector<8x32xf32> -> vector<8x32xf32>
    %9 = vector.shape_cast %8 : vector<8x32xf32> to vector<1x8x32xf32>
    %10 = vector.extract_strided_slice %0 {offsets = [0, 32], sizes = [32, 32], strides = [1, 1]} : vector<32x96xf32> to vector<32x32xf32>
    %cst_10 = arith.constant dense<0.000000e+00> : vector<8x32xf32>
    %11 = tpu.matmul %4, %10, %cst_10 {dimension_numbers = #tpu.dot_dimension_numbers<[1], [0], [0], [1], [0, 0, 1, 1], [], []>} : vector<8x32xf32>, vector<32x32xf32>, vector<8x32xf32> -> vector<8x32xf32>
    %12 = vector.shape_cast %11 : vector<8x32xf32> to vector<1x8x32xf32>
    %13 = vector.extract_strided_slice %0 {offsets = [0, 64], sizes = [32, 32], strides = [1, 1]} : vector<32x96xf32> to vector<32x32xf32>
    %cst_11 = arith.constant dense<0.000000e+00> : vector<8x32xf32>
    %14 = tpu.matmul %6, %13, %cst_11 {dimension_numbers = #tpu.dot_dimension_numbers<[1], [0], [0], [1], [0, 0, 1, 1], [], []>} : vector<8x32xf32>, vector<32x32xf32>, vector<8x32xf32> -> vector<8x32xf32>
    %15 = vector.shape_cast %14 : vector<8x32xf32> to vector<1x8x32xf32>
    %16 = vector.extract_strided_slice %9 {offsets = [0, 0, 0], sizes = [1, 8, 8], strides = [1, 1, 1]} : vector<1x8x32xf32> to vector<1x8x8xf32>
    %17 = vector.extract_strided_slice %12 {offsets = [0, 0, 0], sizes = [1, 8, 8], strides = [1, 1, 1]} : vector<1x8x32xf32> to vector<1x8x8xf32>
    %18 = vector.extract_strided_slice %15 {offsets = [0, 0, 0], sizes = [1, 8, 8], strides = [1, 1, 1]} : vector<1x8x32xf32> to vector<1x8x8xf32>
    "tpu.trace_start"() <{level = 10 : i32, message = "bqd,bkd->bqk"}> : () -> ()
    %cst_12 = arith.constant dense<0.000000e+00> : vector<1x8x8xf32>
    %19 = tpu.matmul %16, %17, %cst_12 {dimension_numbers = #tpu.dot_dimension_numbers<[2], [2], [1], [1], [0, 0, 0, 1, 1, 1], [0], [0]>} : vector<1x8x8xf32>, vector<1x8x8xf32>, vector<1x8x8xf32> -> vector<1x8x8xf32>
    "tpu.trace_stop"() : () -> ()
    %cst_13 = arith.constant dense<0xFF800000> : vector<1x8xf32>
    %20 = vector.multi_reduction <maximumf>, %19, %cst_13 [2] : vector<1x8x8xf32> to vector<1x8xf32>
    %21 = vector.shape_cast %20 : vector<1x8xf32> to vector<1x8x1xf32>
    %22 = vector.broadcast %21 : vector<1x8x1xf32> to vector<1x8x8xf32>
    %23 = arith.subf %19, %22 : vector<1x8x8xf32>
    %24 = math.exp %23 : vector<1x8x8xf32>
    %cst_14 = arith.constant dense<0.000000e+00> : vector<1x8xf32>
    %25 = vector.multi_reduction <add>, %24, %cst_14 [2] : vector<1x8x8xf32> to vector<1x8xf32>
    %26 = vector.shape_cast %25 : vector<1x8xf32> to vector<1x8x1xf32>
    "tpu.trace_start"() <{level = 10 : i32, message = "bqk,bkd->bqd"}> : () -> ()
    %cst_15 = arith.constant dense<0.000000e+00> : vector<1x8x8xf32>
    %27 = tpu.matmul %24, %18, %cst_15 {dimension_numbers = #tpu.dot_dimension_numbers<[2], [1], [1], [2], [0, 0, 0, 1, 1, 2], [0], [0]>} : vector<1x8x8xf32>, vector<1x8x8xf32>, vector<1x8x8xf32> -> vector<1x8x8xf32>
    "tpu.trace_stop"() : () -> ()
    %28 = tpu.reciprocal %26 {approx = true} : vector<1x8x1xf32> -> vector<1x8x1xf32>
    %29 = vector.broadcast %28 : vector<1x8x1xf32> to vector<1x8x8xf32>
    %30 = arith.mulf %27, %29 : vector<1x8x8xf32>
    %31 = vector.shape_cast %30 : vector<1x8x8xf32> to vector<8x8xf32>
    %c0_16 = arith.constant 0 : index
    %c0_17 = arith.constant 0 : index
    %32 = vector.load %arg8[%c0_16, %c0_17] : memref<8x32xf32, #tpu.memory_space<vmem>>, vector<8x8xf32>
    tpu.vector_store %arg8[%c0_16, %c0_17], %31 {strides = array<i32>} : memref<8x32xf32, #tpu.memory_space<vmem>>, vector<8x8xf32>,
    %33 = vector.extract_strided_slice %9 {offsets = [0, 0, 8], sizes = [1, 8, 8], strides = [1, 1, 1]} : vector<1x8x32xf32> to vector<1x8x8xf32>
    %34 = vector.extract_strided_slice %12 {offsets = [0, 0, 8], sizes = [1, 8, 8], strides = [1, 1, 1]} : vector<1x8x32xf32> to vector<1x8x8xf32>
    %35 = vector.extract_strided_slice %15 {offsets = [0, 0, 8], sizes = [1, 8, 8], strides = [1, 1, 1]} : vector<1x8x32xf32> to vector<1x8x8xf32>
    "tpu.trace_start"() <{level = 10 : i32, message = "bqd,bkd->bqk"}> : () -> ()
    %cst_18 = arith.constant dense<0.000000e+00> : vector<1x8x8xf32>
    %36 = tpu.matmul %33, %34, %cst_18 {dimension_numbers = #tpu.dot_dimension_numbers<[2], [2], [1], [1], [0, 0, 0, 1, 1, 1], [0], [0]>} : vector<1x8x8xf32>, vector<1x8x8xf32>, vector<1x8x8xf32> -> vector<1x8x8xf32>
    "tpu.trace_stop"() : () -> ()
    %cst_19 = arith.constant dense<0xFF800000> : vector<1x8xf32>
    %37 = vector.multi_reduction <maximumf>, %36, %cst_19 [2] : vector<1x8x8xf32> to vector<1x8xf32>
    %38 = vector.shape_cast %37 : vector<1x8xf32> to vector<1x8x1xf32>
    %39 = vector.broadcast %38 : vector<1x8x1xf32> to vector<1x8x8xf32>
    %40 = arith.subf %36, %39 : vector<1x8x8xf32>
    %41 = math.exp %40 : vector<1x8x8xf32>
    %cst_20 = arith.constant dense<0.000000e+00> : vector<1x8xf32>
    %42 = vector.multi_reduction <add>, %41, %cst_20 [2] : vector<1x8x8xf32> to vector<1x8xf32>
    %43 = vector.shape_cast %42 : vector<1x8xf32> to vector<1x8x1xf32>
    "tpu.trace_start"() <{level = 10 : i32, message = "bqk,bkd->bqd"}> : () -> ()
    %cst_21 = arith.constant dense<0.000000e+00> : vector<1x8x8xf32>
    %44 = tpu.matmul %41, %35, %cst_21 {dimension_numbers = #tpu.dot_dimension_numbers<[2], [1], [1], [2], [0, 0, 0, 1, 1, 2], [0], [0]>} : vector<1x8x8xf32>, vector<1x8x8xf32>, vector<1x8x8xf32> -> vector<1x8x8xf32>
    "tpu.trace_stop"() : () -> ()
    %45 = tpu.reciprocal %43 {approx = true} : vector<1x8x1xf32> -> vector<1x8x1xf32>
    %46 = vector.broadcast %45 : vector<1x8x1xf32> to vector<1x8x8xf32>
    %47 = arith.mulf %44, %46 : vector<1x8x8xf32>
    %48 = vector.shape_cast %47 : vector<1x8x8xf32> to vector<8x8xf32>
    %c0_22 = arith.constant 0 : index
    %c8 = arith.constant 8 : index
    %49 = vector.load %arg8[%c0_22, %c8] : memref<8x32xf32, #tpu.memory_space<vmem>>, vector<8x8xf32>
    tpu.vector_store %arg8[%c0_22, %c8], %48 {strides = array<i32>} : memref<8x32xf32, #tpu.memory_space<vmem>>, vector<8x8xf32>,
    %50 = vector.extract_strided_slice %9 {offsets = [0, 0, 16], sizes = [1, 8, 8], strides = [1, 1, 1]} : vector<1x8x32xf32> to vector<1x8x8xf32>
    %51 = vector.extract_strided_slice %12 {offsets = [0, 0, 16], sizes = [1, 8, 8], strides = [1, 1, 1]} : vector<1x8x32xf32> to vector<1x8x8xf32>
    %52 = vector.extract_strided_slice %15 {offsets = [0, 0, 16], sizes = [1, 8, 8], strides = [1, 1, 1]} : vector<1x8x32xf32> to vector<1x8x8xf32>
    "tpu.trace_start"() <{level = 10 : i32, message = "bqd,bkd->bqk"}> : () -> ()
    %cst_23 = arith.constant dense<0.000000e+00> : vector<1x8x8xf32>
    %53 = tpu.matmul %50, %51, %cst_23 {dimension_numbers = #tpu.dot_dimension_numbers<[2], [2], [1], [1], [0, 0, 0, 1, 1, 1], [0], [0]>} : vector<1x8x8xf32>, vector<1x8x8xf32>, vector<1x8x8xf32> -> vector<1x8x8xf32>
    "tpu.trace_stop"() : () -> ()
    %cst_24 = arith.constant dense<0xFF800000> : vector<1x8xf32>
    %54 = vector.multi_reduction <maximumf>, %53, %cst_24 [2] : vector<1x8x8xf32> to vector<1x8xf32>
    %55 = vector.shape_cast %54 : vector<1x8xf32> to vector<1x8x1xf32>
    %56 = vector.broadcast %55 : vector<1x8x1xf32> to vector<1x8x8xf32>
    %57 = arith.subf %53, %56 : vector<1x8x8xf32>
    %58 = math.exp %57 : vector<1x8x8xf32>
    %cst_25 = arith.constant dense<0.000000e+00> : vector<1x8xf32>
    %59 = vector.multi_reduction <add>, %58, %cst_25 [2] : vector<1x8x8xf32> to vector<1x8xf32>
    %60 = vector.shape_cast %59 : vector<1x8xf32> to vector<1x8x1xf32>
    "tpu.trace_start"() <{level = 10 : i32, message = "bqk,bkd->bqd"}> : () -> ()
    %cst_26 = arith.constant dense<0.000000e+00> : vector<1x8x8xf32>
    %61 = tpu.matmul %58, %52, %cst_26 {dimension_numbers = #tpu.dot_dimension_numbers<[2], [1], [1], [2], [0, 0, 0, 1, 1, 2], [0], [0]>} : vector<1x8x8xf32>, vector<1x8x8xf32>, vector<1x8x8xf32> -> vector<1x8x8xf32>
    "tpu.trace_stop"() : () -> ()
    %62 = tpu.reciprocal %60 {approx = true} : vector<1x8x1xf32> -> vector<1x8x1xf32>
    %63 = vector.broadcast %62 : vector<1x8x1xf32> to vector<1x8x8xf32>
    %64 = arith.mulf %61, %63 : vector<1x8x8xf32>
    %65 = vector.shape_cast %64 : vector<1x8x8xf32> to vector<8x8xf32>
    %c0_27 = arith.constant 0 : index
    %c16 = arith.constant 16 : index
    %66 = vector.load %arg8[%c0_27, %c16] : memref<8x32xf32, #tpu.memory_space<vmem>>, vector<8x8xf32>
    tpu.vector_store %arg8[%c0_27, %c16], %65 {strides = array<i32>} : memref<8x32xf32, #tpu.memory_space<vmem>>, vector<8x8xf32>,
    %67 = vector.extract_strided_slice %9 {offsets = [0, 0, 24], sizes = [1, 8, 8], strides = [1, 1, 1]} : vector<1x8x32xf32> to vector<1x8x8xf32>
    %68 = vector.extract_strided_slice %12 {offsets = [0, 0, 24], sizes = [1, 8, 8], strides = [1, 1, 1]} : vector<1x8x32xf32> to vector<1x8x8xf32>
    %69 = vector.extract_strided_slice %15 {offsets = [0, 0, 24], sizes = [1, 8, 8], strides = [1, 1, 1]} : vector<1x8x32xf32> to vector<1x8x8xf32>
    "tpu.trace_start"() <{level = 10 : i32, message = "bqd,bkd->bqk"}> : () -> ()
    %cst_28 = arith.constant dense<0.000000e+00> : vector<1x8x8xf32>
    %70 = tpu.matmul %67, %68, %cst_28 {dimension_numbers = #tpu.dot_dimension_numbers<[2], [2], [1], [1], [0, 0, 0, 1, 1, 1], [0], [0]>} : vector<1x8x8xf32>, vector<1x8x8xf32>, vector<1x8x8xf32> -> vector<1x8x8xf32>
    "tpu.trace_stop"() : () -> ()
    %cst_29 = arith.constant dense<0xFF800000> : vector<1x8xf32>
    %71 = vector.multi_reduction <maximumf>, %70, %cst_29 [2] : vector<1x8x8xf32> to vector<1x8xf32>
    %72 = vector.shape_cast %71 : vector<1x8xf32> to vector<1x8x1xf32>
    %73 = vector.broadcast %72 : vector<1x8x1xf32> to vector<1x8x8xf32>
    %74 = arith.subf %70, %73 : vector<1x8x8xf32>
    %75 = math.exp %74 : vector<1x8x8xf32>
    %cst_30 = arith.constant dense<0.000000e+00> : vector<1x8xf32>
    %76 = vector.multi_reduction <add>, %75, %cst_30 [2] : vector<1x8x8xf32> to vector<1x8xf32>
    %77 = vector.shape_cast %76 : vector<1x8xf32> to vector<1x8x1xf32>
    "tpu.trace_start"() <{level = 10 : i32, message = "bqk,bkd->bqd"}> : () -> ()
    %cst_31 = arith.constant dense<0.000000e+00> : vector<1x8x8xf32>
    %78 = tpu.matmul %75, %69, %cst_31 {dimension_numbers = #tpu.dot_dimension_numbers<[2], [1], [1], [2], [0, 0, 0, 1, 1, 2], [0], [0]>} : vector<1x8x8xf32>, vector<1x8x8xf32>, vector<1x8x8xf32> -> vector<1x8x8xf32>
    "tpu.trace_stop"() : () -> ()
    %79 = tpu.reciprocal %77 {approx = true} : vector<1x8x1xf32> -> vector<1x8x1xf32>
    %80 = vector.broadcast %79 : vector<1x8x1xf32> to vector<1x8x8xf32>
    %81 = arith.mulf %78, %80 : vector<1x8x8xf32>
    %82 = vector.shape_cast %81 : vector<1x8x8xf32> to vector<8x8xf32>
    %c0_32 = arith.constant 0 : index
    %c24 = arith.constant 24 : index
    %83 = vector.load %arg8[%c0_32, %c24] : memref<8x32xf32, #tpu.memory_space<vmem>>, vector<8x8xf32>
    tpu.vector_store %arg8[%c0_32, %c24], %82 {strides = array<i32>} : memref<8x32xf32, #tpu.memory_space<vmem>>, vector<8x8xf32>,
    %c0_33 = arith.constant 0 : index
    %c0_34 = arith.constant 0 : index
    %84 = vector.load %arg8[%c0_33, %c0_34] : memref<8x32xf32, #tpu.memory_space<vmem>>, vector<8x32xf32>
    %c0_35 = arith.constant 0 : index
    %c0_36 = arith.constant 0 : index
    %85 = vector.load %arg5[%c0_35, %c0_36] : memref<32x32xf32, #tpu.memory_space<vmem>>, vector<32x32xf32>
    %cst_37 = arith.constant dense<0.000000e+00> : vector<8x32xf32>
    %86 = tpu.matmul %84, %85, %cst_37 {dimension_numbers = #tpu.dot_dimension_numbers<[1], [0], [0], [1], [0, 0, 1, 1], [], []>} : vector<8x32xf32>, vector<32x32xf32>, vector<8x32xf32> -> vector<8x32xf32>
    %c0_38 = arith.constant 0 : index
    %c0_39 = arith.constant 0 : index
    %87 = vector.load %arg6[%c0_38, %c0_39] : memref<1x32xf32, #tpu.memory_space<vmem>>, vector<1x32xf32>
    %88 = vector.broadcast %87 : vector<1x32xf32> to vector<8x32xf32>
    %89 = arith.addf %86, %88 : vector<8x32xf32>
    %90 = vector.shape_cast %89 : vector<8x32xf32> to vector<1x8x32xf32>
    %c0_40 = arith.constant 0 : index
    %c0_41 = arith.constant 0 : index
    %c0_42 = arith.constant 0 : index
    %91 = vector.load %arg7[%c0_40, %c0_41, %c0_42] : memref<1x8x32xf32, #tpu.memory_space<vmem>>, vector<1x8x32xf32>
    tpu.vector_store %arg7[%c0_40, %c0_41, %c0_42], %90 {strides = array<i32>} : memref<1x8x32xf32, #tpu.memory_space<vmem>>, vector<1x8x32xf32>,
    return
  }
  func.func @transform_0(%arg0: i32) -> (i32, i32, i32) {
    %c0_i32 = arith.constant 0 : i32
    %c0_i32_0 = arith.constant 0 : i32
    %c0_i32_1 = arith.constant 0 : i32
    return %arg0, %c0_i32, %c0_i32_0 : i32, i32, i32
  }
  func.func @transform_1(%arg0: i32) -> (i32, i32, i32) {
    %c0_i32 = arith.constant 0 : i32
    %c0_i32_0 = arith.constant 0 : i32
    %c0_i32_1 = arith.constant 0 : i32
    return %arg0, %c0_i32, %c0_i32_0 : i32, i32, i32
  }
  func.func @transform_2(%arg0: i32) -> (i32, i32, i32) {
    %c0_i32 = arith.constant 0 : i32
    %c0_i32_0 = arith.constant 0 : i32
    %c0_i32_1 = arith.constant 0 : i32
    return %arg0, %c0_i32, %c0_i32_0 : i32, i32, i32
  }
  func.func @transform_3(%arg0: i32) -> (i32, i32) {
    %c0_i32 = arith.constant 0 : i32
    %c0_i32_0 = arith.constant 0 : i32
    %c0_i32_1 = arith.constant 0 : i32
    return %c0_i32, %c0_i32_0 : i32, i32
  }
  func.func @transform_4(%arg0: i32) -> (i32, i32) {
    %c0_i32 = arith.constant 0 : i32
    %c0_i32_0 = arith.constant 0 : i32
    %c0_i32_1 = arith.constant 0 : i32
    return %c0_i32, %c0_i32_0 : i32, i32
  }
  func.func @transform_5(%arg0: i32) -> (i32, i32) {
    %c0_i32 = arith.constant 0 : i32
    %c0_i32_0 = arith.constant 0 : i32
    %c0_i32_1 = arith.constant 0 : i32
    return %c0_i32, %c0_i32_0 : i32, i32
  }
  func.func @transform_6(%arg0: i32) -> (i32, i32, i32) {
    %c0_i32 = arith.constant 0 : i32
    %c0_i32_0 = arith.constant 0 : i32
    %c0_i32_1 = arith.constant 0 : i32
    return %arg0, %c0_i32, %c0_i32_0 : i32, i32, i32
  }
}

</mosaic_0001>

<bundles_post_ra>
// kernel: tpu_custom_call.1
= control target key start
LH: loop header
LB: loop body
LE: loop exit
PB: predicated region body
PF: predicated region fallthrough
CT: control target
= control target key end

     0   :  { %s2503_s0 = inlined_call_operand.hbm [shape: f32[2,8,32], index: 0, kind: input, shape index: {}]   ;;  %s2504_s1 = inlined_call_operand.hbm [shape: f32[2,8,32], index: 1, kind: input, shape index: {}]   ;;  %s2505_s2 = inlined_call_operand.hbm [shape: f32[2,8,32], index: 2, kind: input, shape index: {}]   ;;  %s2506_s3 = inlined_call_operand.hbm [shape: f32[32,96], index: 3, kind: input, shape index: {}]   ;;  %s2507_s4 = inlined_call_operand.hbm [shape: f32[32,32], index: 4, kind: input, shape index: {}]   ;;  %s2508_s5 = inlined_call_operand.vmem [shape: f32[1,32], index: 5, kind: input, shape index: {}]   ;;  %s2509_s6 = inlined_call_operand.hbm [shape: f32[2,8,32], index: 6, kind: output, shape index: {}]  }
   0x1   :  { %2526 = sst [smem:[#allocation19_spill]] %s2504_s1 }
   0x2   :  { %2527 = sst [smem:[#allocation20_spill]] %s2506_s3 }
   0x3   :  { %11 = vsyncpa [#allocation4], 0 }
   0x4   :  { %13 = vsyncpa [#allocation4 + $0x1], 0 }
   0x5   :  { %14 = vsyncpa [#allocation7], 0 }
   0x6   :  { %16 = vsyncpa [#allocation7 + $0x1], 0 }
   0x7   :  { %17 = vsyncpa [#allocation10], 0 }
   0x8   :  { %18 = vsyncpa [#allocation5], 0 }
   0x9   :  { %20 = vsyncpa [#allocation5 + $0x1], 0  ;;  %s2115_s21 = smov 0   ;;  %s2117_s22 = smov 0  }
   0xa   :  { %s2119_s23 = smov 0   ;;  %s2121_s24 = smov 0  }
   0xb LB: > { %s2136_s25 = sadd.s32 4294967295, %s2059_s24   ;;  %s1530_s26 = sadd.s32 4294967294, %s2059_s24   ;;  %s2059_s24 = sphi %s2121_s24, %s2556_s24   ;;  %s2055_s23 = sphi %s2119_s23, %s2560_s23   ;;  %s2051_s22 = sphi %s2117_s22, %s2559_s22   ;;  %s2047_s21 = sphi %s2115_s21, %s2558_s21  }
   0xc   : > { %p46_p0 = scmp.ne.s32.totalorder %s2051_s22, %s2047_s21  ;;  %p2510_p1 = scmp.eq.s32.totalorder %s2136_s25, 0 }
   0xd   : > { %p191_p3 = scmp.eq.s32.totalorder %s1530_s26, 1  ;;  %p1531_p5 = scmp.ge.s32.totalorder %s2059_s24, 1 }
   0xe   : > { %p2145_p4 = por %p2510_p1, %p46_p0  ;;  %p198_p7 = scmp.lt.s32.totalorder %s2059_s24, 3 }
   0xf   : > { %p2150_p6 = por %p191_p3, %p46_p0  ;;  %s2061_s30 = smov [#allocation9]  }
  0x10   : > { %s2528_s27 = scalar_select %p2145_p4, 1, 0 }
  0x11   : > { %s2529_s28 = scalar_select %p2150_p6, 1, 0 }
  0x12   : > { %p2155_p8 = pnand %p1531_p5, %p198_p7  ;;  %s210_s7 = sshll.u32 %s2061_s30, 4  ;;  %s2159_s7 = int_to_ptr.vmem [resolvable:$true] %s210_s7 }
  0x13   : > { %s2171_s9 = sadd.s32 1, %s2059_s24   ;;  %s33_s10 = sadd.s32 1, %s2055_s23 }
  0x14   : > { %s2530_s29 = scalar_select %p2155_p8, 1, 0 }
  0x15   : > { %p1729_p9 = pneg %p2155_p8  ;;  %2532 = sst [smem:[#allocation17_spill]] %s2171_s9 }
  0x16   : > { %s30_s11 = ssub.s32 %s2059_s24, %s2171_s9  ;;  %s2533_s3 = sld [smem:[#allocation20_spill]] }
  0x17   : > { %p2166_p11 = pnand %p1729_p9, %p2510_p1 }
  0x19   : > { %s2531_s8 = scalar_select %p2166_p11, 1, 0 }
  0x1a   : > { %p2514_p13 = pneg %p2166_p11 }
  0x1c   : > { %s1839_s14 = scalar_lea.hbm %s2533_s3, 512 }
  0x1d   : > { %p1840_p12 = scmp.ne.s32.totalorder %s2533_s3, %s1839_s14  ;;  %p1846_p5 = scmp.lt.u32.totalorder %s1839_s14, %s2533_s3 }
  0x1f   : > { %p1842_p0 = pnand %p2514_p13, %p1840_p12 }
  0x21   : > { %p1843_p3 = pneg %p1842_p0 }
  0x23   : > { %p1848_p7 = pnand %p1846_p5, %p1843_p3 }
  0x25   : > { %1851 = shalt.err (!%p1848_p7)
}
  0x26   : > { %s1852_s19 = scalar_lea.vmem %s2159_s7, 512  ;;  %p1860_p2 = scmp.lt.s32.totalorder %s2159_s7, %s2159_s7 }
  0x27   : > { %p1853_p9 = scmp.ne.s32.totalorder %s2159_s7, %s1852_s19  ;;  %p1861_p12 = scmp.lt.s32.totalorder %s1852_s19, %s1852_s19 }
  0x29   : > { %p1855_p10 = pnand %p1853_p9, %p2514_p13  ;;  %p1862_p0 = por %p1861_p12, %p1860_p2 }
  0x2b   : > { %p1856_p1 = pneg %p1855_p10 }
  0x2d   : > { %p1863_p6 = pnand %p1862_p0, %p1856_p1 }
  0x2f   : > { %1866 = shalt.err (!%p1863_p6)
}
  0x30   : > { %s2512_s20 = smov 128   ;;  %s2513_s26 = smov 8  }
  0x31   : > { %1732 = dma.hbm_to_vmem [thread:$0]  (!%p2166_p11), %s2533_s3, 512, %s2159_s7, [#allocation10], %s2512_s20, %s2512_s20, %s2513_s26  }
  0x32   : > { %p31_p1 = scmp.eq.s32.totalorder %s30_s11, 0  ;;  %p40_p2 = scmp.ne.s32.totalorder %s2055_s23, %s2051_s22 }
  0x33   : > { %p41_p6 = scmp.eq.s32.totalorder %s2059_s24, 0  ;;  %p1752_p10 = scmp.lt.s32.totalorder %s2059_s24, 2 }
  0x34   : > { %s2211_s13 = scalar_select %p31_p1, %s2055_s23, %s33_s10  }
  0x35   : > { %p42_p3 = por %p41_p6, %p40_p2  ;;  %p2535_p5 = scmp.eq.s32.totalorder %s2136_s25, 1 }
  0x36   : > { %2534 = sst [smem:[#allocation18_spill]] %s2211_s13  ;;  %s2511_s15 = sand.u32 1, %s2055_s23  }
  0x37   : > { %p2215_p7 = por %p2535_p5, %p40_p2  ;;  %s2221_s16 = sshll.u32 %s2059_s24, 7 }
  0x38   : > { %s2225_s17 = sshll.u32 %s2511_s15, 3  ;;  %p2227_p9 = pnand %p1752_p10, %p42_p3 }
  0x39   : > { %s2536_s14 = scalar_select %p2215_p7, 1, 0 }
  0x3a   : > { %s2537_s7 = scalar_select %p2227_p9, 1, 0 }
  0x3b   : > { %s258_s10 = sand.u32 1, %s2059_s24   ;;  %s2538_s1 = sld [smem:[#allocation19_spill]] }
  0x3c   : > { %s262_s30 = scalar_lea.vmem [#allocation6], %s2225_s17  ;;  %s2241_s15 = scalar_lea.sflag [#allocation7], %s258_s10 }
  0x3d   : > { %s269_s12 = sshll.u32 %s262_s30, 4  ;;  %p2247_p0 = pneg %p2227_p9  ;;  %s2239_s12 = int_to_ptr.vmem [resolvable:$true] %s269_s12 }
  0x3f   : > { %s2539_s26 = scalar_select %p2247_p0, 1, 0 }
  0x41   : > { %s2236_s19 = scalar_lea.hbm %s2538_s1, %s2221_s16  ;;  %s1872_s3 = scalar_lea.hbm %s2538_s1, 256 }
  0x42   : > { %s1867_s20 = scalar_lea.hbm %s2236_s19, 128  ;;  %p1873_p6 = scmp.lt.u32.totalorder %s2236_s19, %s2538_s1 }
  0x43   : > { %p1868_p12 = scmp.ne.s32.totalorder %s2236_s19, %s1867_s20  ;;  %p1874_p10 = scmp.lt.u32.totalorder %s1872_s3, %s1867_s20 }
  0x44   : > { %p1876_p5 = scmp.lt.u32.totalorder %s1867_s20, %s2236_s19 }
  0x45   : > { %p1870_p1 = pnand %p2247_p0, %p1868_p12  ;;  %p1875_p3 = por %p1874_p10, %p1873_p6 }
  0x47   : > { %p1871_p2 = pneg %p1870_p1  ;;  %p1877_p13 = por %p1876_p5, %p1875_p3 }
  0x49   : > { %p1878_p7 = pnand %p1877_p13, %p1871_p2 }
  0x4b   : > { %1881 = shalt.err (!%p1878_p7)
}
  0x4c   : > { %s1882_s10 = scalar_lea.vmem %s2239_s12, 128  ;;  %s2064_s11 = smov [#allocation6]  }
  0x4d   : > { %p1883_p12 = scmp.ne.s32.totalorder %s2239_s12, %s1882_s10  ;;  %s1887_s18 = sshll.u32 %s2064_s11, 4  ;;  %s1888_s18 = int_to_ptr.vmem [resolvable:$false] %s1887_s18 }
  0x4e   : > { %s1889_s13 = scalar_lea.vmem %s1888_s18, 256  ;;  %p1890_p8 = scmp.lt.s32.totalorder %s2239_s12, %s1888_s18 }
  0x4f   : > { %p1885_p1 = pnand %p1883_p12, %p2247_p0  ;;  %p1891_p11 = scmp.lt.s32.totalorder %s1889_s13, %s1882_s10 }
  0x51   : > { %p1886_p4 = pneg %p1885_p1  ;;  %p1892_p6 = por %p1891_p11, %p1890_p8 }
  0x53   : > { %p1893_p10 = pnand %p1892_p6, %p1886_p4 }
  0x55   : > { %1896 = shalt.err (!%p1893_p10)
}
  0x56   : > { %1742 = dma.hbm_to_vmem [thread:$0]  (!%p2227_p9), %s2236_s19, 128, %s2239_s12, %s2241_s15  }
  0x57   : > { %s2065_s3 = smov [#allocation11]   ;;  %s1897_s11 = scalar_lea.hbm %s2507_s4, 512 }
  0x58   : > { %s223_s20 = sshll.u32 %s2065_s3, 4  ;;  %p1898_p8 = scmp.ne.s32.totalorder %s2507_s4, %s1897_s11  ;;  %s224_s20 = int_to_ptr.vmem [resolvable:$true] %s223_s20 }
  0x59   : > { %p2540_p4 = scmp.ne.s32.totalorder %s2531_s8, 0  ;;  %p1904_p2 = scmp.lt.u32.totalorder %s1897_s11, %s2507_s4 }
  0x5b   : > { %p2541_p11 = pneg %p2540_p4 }
  0x5d   : > { %p1900_p13 = pnand %p1898_p8, %p2541_p11 }
  0x5f   : > { %p1901_p7 = pneg %p1900_p13 }
  0x61   : > { %p1906_p3 = pnand %p1904_p2, %p1901_p7 }
  0x63   : > { %1909 = shalt.err (!%p1906_p3)
}
  0x64   : > { %s1910_s19 = scalar_lea.vmem %s224_s20, 512  ;;  %p2542_p12 = pmov %p2541_p11 }
  0x65   : > { %p1911_p5 = scmp.ne.s32.totalorder %s224_s20, %s1910_s19  ;;  %p1918_p10 = scmp.lt.s32.totalorder %s224_s20, %s224_s20 }
  0x66   : > { %p1919_p9 = scmp.lt.s32.totalorder %s1910_s19, %s1910_s19 }
  0x67   : > { %p1913_p1 = pnand %p1911_p5, %p2542_p12 }
  0x68   : > { %p1920_p0 = por %p1919_p9, %p1918_p10 }
  0x69   : > { %p1914_p6 = pneg %p1913_p1 }
  0x6b   : > { %p1921_p8 = pnand %p1920_p0, %p1914_p6 }
  0x6d   : > { %1924 = shalt.err (!%p1921_p8)
}
  0x6e   : > { %s2543_s1 = smov 8   ;;  %s2544_s9 = smov 128  }
  0x6f   : > { %1735 = dma.hbm_to_vmem [thread:$0]  (!%p2540_p4), %s2507_s4, 512, %s224_s20, [#allocation10], %s2544_s9, %s2544_s9, %s2543_s1  }
  0x70   : > { %s2298_s18 = scalar_lea.hbm %s2503_s0, %s2221_s16  ;;  %s244_s8 = scalar_lea.vmem [#allocation3], %s2225_s17 }
  0x71   : > { %s251_s10 = sshll.u32 %s244_s8, 4  ;;  %s2545_s13 = sand.u32 1, %s2055_s23   ;;  %s252_s10 = int_to_ptr.vmem [resolvable:$true] %s251_s10 }
  0x72   : > { %s241_s19 = scalar_lea.sflag [#allocation4], %s2545_s13  ;;  %s1925_s12 = scalar_lea.hbm %s2298_s18, 128 }
  0x73   : > { %p1926_p9 = scmp.ne.s32.totalorder %s2298_s18, %s1925_s12  ;;  %p2546_p0 = scmp.ne.s32.totalorder %s2539_s26, 0 }
  0x74   : > { %s1930_s9 = scalar_lea.hbm %s2503_s0, 256  ;;  %p1931_p4 = scmp.lt.u32.totalorder %s2298_s18, %s2503_s0 }
  0x75   : > { %p1928_p11 = pnand %p1926_p9, %p2546_p0  ;;  %p1932_p7 = scmp.lt.u32.totalorder %s1930_s9, %s1925_s12 }
  0x76   : > { %p1934_p3 = scmp.lt.u32.totalorder %s1925_s12, %s2298_s18 }
  0x77   : > { %p1929_p13 = pneg %p1928_p11  ;;  %p1933_p2 = por %p1932_p7, %p1931_p4 }
  0x79   : > { %p1935_p5 = por %p1934_p3, %p1933_p2 }
  0x7b   : > { %p1936_p12 = pnand %p1935_p5, %p1929_p13 }
  0x7d   : > { %1939 = shalt.err (!%p1936_p12)
}
  0x7e   : > { %s1940_s11 = scalar_lea.vmem %s252_s10, 128  ;;  %s2066_s8 = smov [#allocation3]  }
  0x7f   : > { %p1941_p1 = scmp.ne.s32.totalorder %s252_s10, %s1940_s11  ;;  %s1945_s13 = sshll.u32 %s2066_s8, 4  ;;  %s1946_s13 = int_to_ptr.vmem [resolvable:$false] %s1945_s13 }
  0x80   : > { %s1947_s20 = scalar_lea.vmem %s1946_s13, 256  ;;  %p1948_p8 = scmp.lt.s32.totalorder %s252_s10, %s1946_s13 }
  0x81   : > { %p1943_p6 = pnand %p1941_p1, %p2546_p0  ;;  %p1949_p9 = scmp.lt.s32.totalorder %s1947_s20, %s1940_s11 }
  0x83   : > { %p1944_p10 = pneg %p1943_p6  ;;  %p1950_p11 = por %p1949_p9, %p1948_p8 }
  0x85   : > { %p1951_p4 = pnand %p1950_p11, %p1944_p10 }
  0x87   : > { %1954 = shalt.err (!%p1951_p4)
}
  0x88   : > { %p2547_p7 = scmp.ne.s32.totalorder %s2537_s7, 0  ;;  %s2324_s9 = scalar_lea.hbm %s2505_s2, %s2221_s16 }
  0x89   : > { %s280_s3 = scalar_lea.vmem [#allocation8], %s2225_s17  ;;  %s1955_s11 = scalar_lea.hbm %s2324_s9, 128 }
  0x8a   : > { %1739 = dma.hbm_to_vmem [thread:$0]  (!%p2547_p7), %s2298_s18, 128, %s252_s10, %s241_s19  }
  0x8b   : > { %s287_s30 = sshll.u32 %s280_s3, 4  ;;  %p1956_p13 = scmp.ne.s32.totalorder %s2324_s9, %s1955_s11  ;;  %s288_s30 = int_to_ptr.vmem [resolvable:$true] %s287_s30 }
  0x8c   : > { %s1960_s18 = scalar_lea.hbm %s2505_s2, 256  ;;  %p1961_p5 = scmp.lt.u32.totalorder %s2324_s9, %s2505_s2 }
  0x8d   : > { %p1958_p2 = pnand %p1956_p13, %p2546_p0  ;;  %p1962_p12 = scmp.lt.u32.totalorder %s1960_s18, %s1955_s11 }
  0x8e   : > { %p1964_p6 = scmp.lt.u32.totalorder %s1955_s11, %s2324_s9 }
  0x8f   : > { %p1959_p3 = pneg %p1958_p2  ;;  %p1963_p1 = por %p1962_p12, %p1961_p5 }
  0x91   : > { %p1965_p10 = por %p1964_p6, %p1963_p1 }
  0x93   : > { %p1966_p8 = pnand %p1965_p10, %p1959_p3 }
  0x95   : > { %1969 = shalt.err (!%p1966_p8)
}
  0x96   : > { %s1970_s16 = scalar_lea.vmem %s288_s30, 128  ;;  %s2067_s17 = smov [#allocation8]  }
  0x97   : > { %p1971_p9 = scmp.ne.s32.totalorder %s288_s30, %s1970_s16  ;;  %s1975_s20 = sshll.u32 %s2067_s17, 4  ;;  %s1976_s20 = int_to_ptr.vmem [resolvable:$false] %s1975_s20 }
  0x98   : > { %s1977_s12 = scalar_lea.vmem %s1976_s20, 256  ;;  %p1978_p13 = scmp.lt.s32.totalorder %s288_s30, %s1976_s20 }
  0x99   : > { %p1973_p11 = pnand %p1971_p9, %p2546_p0  ;;  %p1979_p2 = scmp.lt.s32.totalorder %s1977_s12, %s1970_s16 }
  0x9b   : > { %p1974_p4 = pneg %p1973_p11  ;;  %p1980_p7 = por %p1979_p2, %p1978_p13 }
  0x9d   : > { %p1981_p5 = pnand %p1980_p7, %p1974_p4 }
  0x9f   : > { %1984 = shalt.err (!%p1981_p5)
}
  0xa0   : > { %p2548_p12 = scmp.ne.s32.totalorder %s2537_s7, 0  ;;  %p2549_p3 = scmp.ne.s32.totalorder %s2530_s29, 0 }
  0xa1   : > { %s2348_s26 = sand.u32 (!%p2549_p3), 1, %s2051_s22   ;;  %p2550_p0 = scmp.ne.s32.totalorder (!%p2549_p3), %s2528_s27, 0 }
  0xa2   : > { %1745 = dma.hbm_to_vmem [thread:$0]  (!%p2548_p12), %s2324_s9, 128, %s288_s30, %s2241_s15  }
  0xa3   : > { %296 = sbr.rel (%p2549_p3) target bundleno = 1838 (0x72e), region = 44  ;;  %s2351_s1 = sshll.u32 (!%p2549_p3), %s2348_s26, 3 }
  0xa4   : > { %s299_s3 = scalar_lea.sflag (!%p2549_p3), [#allocation4], %s2348_s26  ;;  %s302_s11 = scalar_lea.vmem (!%p2549_p3), [#allocation3], %s2351_s1 }
  0xaa   : > { %2030 = dma.done.wait (%p2550_p0), %s299_s3, 128  }
  0xab   : > { %2032 = vsyncadd (%p2550_p0), %s299_s3, 4294967168  ;;  %s307_s29 = sand.u32 1, %s2136_s25   ;;  %s311_s7 = scalar_lea.vmem [#allocation6], %s2351_s1 }
  0xac   : > { %s308_s15 = scalar_lea.sflag [#allocation7], %s307_s29 }
  0xad   : > { %2034 = dma.done.wait (%p2550_p0), %s308_s15, 256  }
  0xae   : > { %2036 = vsyncadd (%p2550_p0), %s308_s15, 4294967040  ;;  %s320_s9 = scalar_lea.vmem [#allocation8], %s2351_s1  ;;  %p2551_p7 = scmp.eq.s32.totalorder %s2136_s25, 0 }
  0xb0   : > { %2038 = dma.done.wait (%p2551_p7), [#allocation10], 1024   ;;  %p2552_p1 = pmov %p2551_p7 }
  0xb1   : > { %v2068_v0 = vmov 0.0|0.0   ;;  %vm2069_vm0 = vmmov 0   ;;  %v2070_v1 = vmov 0.0   ;;  %v367_v2 = vld [vmem:[#allocation9] sm:$0xff]  ;;  %v368_v3 = vld [vmem:[#allocation9 + $0x8] sm:$0xff]  ;;  %v369_v4 = vld [vmem:[#allocation9 + $0x10] sm:$0xff] }
  0xb2   : > { %2040 = vsyncadd (%p2552_p1), [#allocation10], 4294966272  ;;  %1695 = vmatprep.subr.bf16.mxu1 %v2068_v0  ;;  %1689 = vmatprep.subr.bf16.mxu0 %v2068_v0  ;;  %v1803_v5 = vpack.i.bf16 %v368_v3, %v367_v2  ;;  %v370_v6 = vld [vmem:[#allocation9 + $0x18] sm:$0xff]  ;;  %v1690_v7 = vpack.c.bf16 %v368_v3, %v367_v2  ;;  %s2071_s27 = smov 96   ;;  %s2072_s30 = smov 64   ;;  %vm374_vm1 = vcmask 261120  }
  0xb3   : > { %1624 = vmatprep.mubr.msk.f32.mxu1 %vm2069_vm0, %v2070_v1  ;;  %1613 = vmatprep.mubr.msk.f32.mxu0 %vm2069_vm0, %v2070_v1  ;;  %v1808_v8 = vpack.i.bf16 %v370_v6, %v369_v4  ;;  %v1693_v9 = vpack.c.bf16 %v370_v6, %v369_v4  ;;  %v371_v10 = vld [vmem:[%s302_s11] sm:$0xff]  ;;  %v372_v19 = vld [vmem:[%s311_s7] sm:$0xff]  ;;  %vm622_vm2 = vcmask 64512   ;;  %s2073_s8 = smov 120   ;;  %s2074_s13 = smov 112   ;;  %vm954_vm3 = vcmask 130112  }
  0xb4   : > { %1804 = vrot.lane.b32.xlu0 %v1803_v5, %s2071_s27  ;;  %1691 = vmatpush3.bf16.msra.mxu0 %v1690_v7  ;;  %v373_v30 = vld [vmem:[%s320_s9] sm:$0xff]  ;;  %s2075_s18 = smov 104   ;;  %s2076_s10 = smov 8   ;;  %vm1125_vm4 = vcmask 195712   ;;  %vm1296_vm5 = vcmask 261312  }
  0xb5   : > { %1692 = vmatprep.subr.bf16.mxu0 %v2068_v0  ;;  %1814 = vrot.lane.b32.xlu1 %v1803_v5, %s2072_s30  ;;  %s2077_s19 = smov 16   ;;  %s2078_s16 = smov 24  }
  0xb6   : > { %s1566_s12 = sshll.u32 %s2136_s25, 7  ;;  %s366_s3 = scalar_lea.vmem [#allocation12], %s2351_s1 }
  0xb7   : > { %s1398_s11 = sshll.u32 %s366_s3, 4  ;;  %s2458_s7 = scalar_lea.hbm %s2509_s6, %s1566_s12  ;;  %s2460_s11 = int_to_ptr.vmem [resolvable:$true] %s1398_s11 }
  0xb8   : > { %1809 = vrot.lane.b32.xlu0 %v1808_v8, %s2071_s27  ;;  %1694 = vmatpush3.bf16.msra.mxu0 %v1693_v9  ;;  %s1385_s9 = scalar_lea.sflag [#allocation5], %s2348_s26  ;;  %s1985_s27 = scalar_lea.vmem %s2460_s11, 128 }
  0xb9   : > { %1819 = vrot.lane.b32.xlu1 %v1808_v8, %s2072_s30  ;;  %1701 = vmatprep.subr.bf16.mxu0 %v2068_v0  ;;  %p1986_p6 = scmp.ne.s32.totalorder %s2460_s11, %s1985_s27  ;;  %p2553_p10 = scmp.ne.s32.totalorder %s2536_s14, 0 }
  0xba   : > { %s2079_s25 = smov [#allocation12]  }
  0xbb   : > { %1614 = vmatmul.mubr.msk.f32.vlgmr.msra.gmra.mrb[0].mxu0 %vm374_vm1, %v371_v10  ;;  %p1987_p8 = pnand %p1986_p6, %p2553_p10  ;;  %s1989_s1 = sshll.u32 %s2079_s25, 4  ;;  %s1990_s1 = int_to_ptr.vmem [resolvable:$false] %s1989_s1 }
  0xbc   : > { %1635 = vmatprep.mubr.msk.f32.mxu0 %vm2069_vm0, %v2070_v1  ;;  %s1991_s30 = scalar_lea.vmem %s1990_s1, 256  ;;  %p1992_p11 = scmp.lt.s32.totalorder %s2460_s11, %s1990_s1 }
  0xbd   : > { %p1988_p9 = pneg %p1987_p8  ;;  %p1993_p4 = scmp.lt.s32.totalorder %s1991_s30, %s1985_s27 }
  0xbf   : > { %p1994_p13 = por %p1993_p4, %p1992_p11 }
  0xc1   : > { %p1995_p2 = pnand %p1994_p13, %p1988_p9 }
 0x126   : > { %v1805_v11 = vpop.permute.xlu0 %1804 }
 0x127   : > { %v1807_v12 = vunpack.i.h.bf16 %v1805_v11  ;;  %v1806_v13 = vunpack.i.l.bf16 %v1805_v11  ;;  %v1815_v22 = vpop.permute.xlu1 %1814 }
 0x128   : > { %v1817_v23 = vunpack.i.h.bf16 %v1815_v22  ;;  %v1816_v24 = vunpack.i.l.bf16 %v1815_v22  ;;  %v1299_v22 = vld [vmem:[#allocation11] sm:$0xff] }
 0x129   : > { %v1696_v14 = vpack.c.bf16 %v1807_v12, %v1806_v13 }
 0x12a   : > { %v1810_v15 = vpop.permute.xlu0 %1809  ;;  %v1702_v25 = vpack.c.bf16 %v1817_v23, %v1816_v24  ;;  %v1300_v23 = vld [vmem:[#allocation11 + $0x8] sm:$0xff]  ;;  %v1301_v24 = vld [vmem:[#allocation11 + $0x10] sm:$0xff] }
 0x12b   : > { %v1812_v16 = vunpack.i.h.bf16 %v1810_v15  ;;  %v1811_v17 = vunpack.i.l.bf16 %v1810_v15  ;;  %1697 = vmatpush3.bf16.msra.mxu1 %v1696_v14  ;;  %v1820_v26 = vpop.permute.xlu1 %1819 }
 0x12c   : > { %1698 = vmatprep.subr.bf16.mxu1 %v2068_v0  ;;  %v1822_v27 = vunpack.i.h.bf16 %v1820_v26  ;;  %v1821_v28 = vunpack.i.l.bf16 %v1820_v26  ;;  %1703 = vmatpush3.bf16.msra.mxu0 %v1702_v25  ;;  %v1302_v25 = vld [vmem:[#allocation11 + $0x18] sm:$0xff] }
 0x12d   : > { %v1699_v18 = vpack.c.bf16 %v1812_v16, %v1811_v17  ;;  %1704 = vmatprep.subr.bf16.mxu0 %v2068_v0 }
 0x12e   : > { %v1705_v29 = vpack.c.bf16 %v1822_v27, %v1821_v28  ;;  %v1711_v28 = vpack.c.bf16 %v1302_v25, %v1301_v24 }
 0x12f   : > { %1700 = vmatpush3.bf16.msra.mxu1 %v1699_v18 }
 0x130   : > { %1638 = vmatprep.subr.mxu1 %v2070_v1  ;;  %1706 = vmatpush3.bf16.msra.mxu0 %v1705_v29 }
 0x131   : > { %1658 = vmatprep.subr.mxu0 %v2070_v1 }
 0x132   : > { %1625 = vmatmul.mubr.msk.f32.vlgmr.msra.gmra.mrb[0].mxu1 %vm374_vm1, %v372_v19 }
 0x133   : > { %1640 = vmatprep.mubr.msk.f32.mxu1 %vm2069_vm0, %v2070_v1  ;;  %1636 = vmatmul.mubr.msk.f32.vlgmr.msra.gmra.mrb[2].mxu0 %vm374_vm1, %v373_v30 }
 0x134   : > { %1660 = vmatprep.mubr.msk.f32.mxu0 %vm2069_vm0, %v2070_v1 }
 0x18e   : > { %v444_v20 = vpop.f32.mrb[0].mxu0 }
 0x18f   : > { %v1615_v21 = vpop.f32.mrb[1].mxu0 }
 0x205   : > { %v533_v31 = vpop.f32.mrb[0].mxu1 }
 0x206   : > { %786 = vrot.lane.b32.xlu1 %v533_v31, %s2073_s8  ;;  %v1626_v32 = vpop.f32.mrb[1].mxu1  ;;  %1639 = vmatpush3.xpose.msk.msra.mxu1 %vm622_vm2, %v533_v31  ;;  %v618_v34 = vpop.f32.mrb[2].mxu0 }
 0x207   : > { %1643 = vmatprep.subr.mxu1 %v2070_v1  ;;  %v1637_v35 = vpop.f32.mrb[3].mxu0 }
 0x209   : > { %1641 = vmatmul.mubr.msk.f32.vlgmr.msra.gmra.mrb[2].mxu1 %vm622_vm2, %v444_v20 }
 0x20a   : > { %784 = vrot.lane.b32.xlu1 %v444_v20, %s2073_s8  ;;  %1645 = vmatprep.mubr.msk.f32.mxu1 %vm2069_vm0, %v2070_v1 }
 0x20b   : > { %1644 = vmatpush3.msra.mxu1 %v618_v34 }
 0x20c   : > { %1648 = vmatprep.subr.mxu1 %v2070_v1 }
 0x20e   : > { %958 = vrot.lane.b32.xlu1 %v533_v31, %s2074_s13 }
 0x212   : > { %956 = vrot.lane.b32.xlu1 %v444_v20, %s2074_s13 }
 0x216   : > { %1129 = vrot.lane.b32.xlu1 %v533_v31, %s2075_s18 }
 0x21a   : > { %1127 = vrot.lane.b32.xlu1 %v444_v20, %s2075_s18 }
 0x278   : > { %v787_v33 = vpop.permute.xlu1 %786 }
 0x27c   : > { %v785_v36 = vpop.permute.xlu1 %784 }
 0x280   : > { %v959_v37 = vpop.permute.xlu1 %958 }
 0x281   : > { %1659 = vmatpush3.xpose.msk.msra.mxu0 %vm622_vm2, %v959_v37 }
 0x282   : > { %1668 = vmatprep.subr.mxu0 %v2070_v1 }
 0x284   : > { %v957_v38 = vpop.permute.xlu1 %956 }
 0x285   : > { %1661 = vmatmul.mubr.msk.f32.vlgmr.msra.gmra.mrb[4].mxu0 %vm622_vm2, %v957_v38 }
 0x286   : > { %1670 = vmatprep.mubr.msk.f32.mxu0 %vm2069_vm0, %v2070_v1 }
 0x288   : > { %v1130_v39 = vpop.permute.xlu1 %1129 }
 0x289   : > { %1669 = vmatpush3.xpose.msk.msra.mxu0 %vm622_vm2, %v1130_v39 }
 0x28a   : > { %1707 = vmatprep.subr.bf16.mxu0 %v2068_v0 }
 0x28c   : > { %v1128_v40 = vpop.permute.xlu1 %1127 }
 0x28d   : > { %1671 = vmatmul.mubr.msk.f32.vlgmr.msra.gmra.mrb[6].mxu0 %vm622_vm2, %v1128_v40 }
 0x28e   : > { %1686 = vmatprep.mubr.msk.f32.mxu0 %vm2069_vm0, %v2070_v1 }
 0x2dc   : > { %v695_v41 = vpop.f32.mrb[2].mxu1 }
 0x2dd   : > { %v1642_v42 = vpop.f32.mrb[3].mxu1  ;;  %v699_v43 = vsel %vm622_vm2, %v695_v41, -inf }
 0x2de   : > { %700 = vmax.xlane.f32.xlu0 %v699_v43  ;;  %v1563_v42 = vld [vmem:[%s2508_s5] ss:$0 sm:$0xff] }
 0x2f4   : > { %872 = vrot.lane.b32.xlu0 %v618_v34, %s2073_s8 }
 0x358   : > { %v1030_v44 = vpop.f32.mrb[4].mxu0 }
 0x359   : > { %v1662_v45 = vpop.f32.mrb[5].mxu0  ;;  %v1034_v46 = vsel %vm622_vm2, %v1030_v44, -inf }
 0x35a   : > { %1035 = vmax.xlane.f32.xlu0 %v1034_v46 }
 0x360   : > { %v1201_v47 = vpop.f32.mrb[6].mxu0 }
 0x361   : > { %v1672_v48 = vpop.f32.mrb[7].mxu0  ;;  %v1205_v49 = vsel %vm622_vm2, %v1201_v47, -inf }
 0x362   : > { %1206 = vmax.xlane.f32.xlu0 %v1205_v49 }
 0x36b   : > { %v701_v50 = vpop.xlane.xlu0 %700 }
 0x36c   : > { %v702_v51 = vsub.f32 %v695_v41, %v701_v50 }
 0x36e   : > { %v703_v52 = vmul.f32 1.442695, %v702_v51 }
 0x36f   : > { %v873_v54 = vpop.permute.xlu0 %872 }
 0x370   : > { %1823 = vpow2.f32 %v703_v52 }
 0x378   : > { %1214 = vrot.lane.b32.xlu0 %v618_v34, %s2075_s18 }
 0x37a   : > { %v1824_v53 = vpop.eup %1823 }
 0x37b   : > { %1646 = vmatmul.mubr.msk.f32.vlgmr.msra.gmra.mrb[4].mxu1 %vm622_vm2, %v1824_v53  ;;  %v705_v15 = vsel %vm622_vm2, %v1824_v53, 0.0 }
 0x37c   : > { %1649 = vmatpush3.xpose.msk.msra.mxu1 %vm622_vm2, %v787_v33  ;;  %1650 = vmatprep.mubr.msk.f32.mxu1 %vm2069_vm0, %v2070_v1 }
 0x37d   : > { %1653 = vmatprep.subr.mxu1 %v2070_v1 }
 0x37f   : > { %1651 = vmatmul.mubr.msk.f32.vlgmr.msra.gmra.mrb[6].mxu1 %vm622_vm2, %v785_v36 }
 0x380   : > { %1654 = vmatpush3.msra.mxu1 %v873_v54  ;;  %1655 = vmatprep.mubr.msk.f32.mxu1 %vm2069_vm0, %v2070_v1 }
 0x381   : > { %1663 = vmatprep.subr.mxu1 %v2070_v1 }
 0x3e7   : > { %v1036_v60 = vpop.xlane.xlu0 %1035 }
 0x3e8   : > { %v1037_v61 = vsub.f32 %v1030_v44, %v1036_v60 }
 0x3ea   : > { %v1038_v62 = vmul.f32 1.442695, %v1037_v61 }
 0x3ec   : > { %1825 = vpow2.f32 %v1038_v62 }
 0x3ef   : > { %v1207_v3 = vpop.xlane.xlu0 %1206 }
 0x3f0   : > { %v1208_v4 = vsub.f32 %v1201_v47, %v1207_v3 }
 0x3f2   : > { %v1209_v7 = vmul.f32 1.442695, %v1208_v4 }
 0x3f3   : > { %v1215_v13 = vpop.permute.xlu0 %1214 }
 0x3f6   : > { %v1826_v63 = vpop.eup %1825 }
 0x3f7   : > { %v1040_v2 = vsel %vm622_vm2, %v1826_v63, 0.0 }
 0x44e   : > { %v777_v55 = vpop.f32.mrb[4].mxu1 }
 0x44f   : > { %v1647_v56 = vpop.f32.mrb[5].mxu1 }
 0x452   : > { %v858_v57 = vpop.f32.mrb[6].mxu1 }
 0x453   : > { %v1652_v58 = vpop.f32.mrb[7].mxu1  ;;  %v862_v59 = vsel %vm622_vm2, %v858_v57, -inf }
 0x454   : > { %863 = vmax.xlane.f32.xlu1 %v862_v59 }
 0x465   : > { %1043 = vrot.lane.b32.xlu1 %v618_v34, %s2074_s13 }
 0x489   : > { %1041 = vadd.xlane.f32.xlu1 %v1040_v2 }
 0x4e1   : > { %v864_v5 = vpop.xlane.xlu1 %863 }
 0x4e2   : > { %v865_v6 = vsub.f32 %v858_v57, %v864_v5 }
 0x4e4   : > { %v866_v8 = vmul.f32 1.442695, %v865_v6 }
 0x4e5   : > { %v1044_v10 = vpop.permute.xlu1 %1043 }
 0x4e6   : > { %1827 = vpow2.f32 %v866_v8 }
 0x4e7   : > { %1829 = vpow2.f32 %v1209_v7 }
 0x4f0   : > { %v1828_v9 = vpop.eup %1827 }
 0x4f1   : > { %1656 = vmatmul.mubr.msk.f32.vlgmr.msra.gmra.mrb[8].mxu1 %vm622_vm2, %v1828_v9  ;;  %v868_v11 = vsel %vm622_vm2, %v1828_v9, 0.0  ;;  %v1830_v12 = vpop.eup %1829 }
 0x4f2   : > { %1664 = vmatpush3.msra.mxu1 %v1044_v10  ;;  %869 = vadd.xlane.f32.xlu0 %v868_v11  ;;  %v1211_v14 = vsel %vm622_vm2, %v1830_v12, 0.0 }
 0x4f3   : > { %1665 = vmatprep.mubr.msk.f32.mxu1 %vm2069_vm0, %v2070_v1  ;;  %1673 = vmatprep.subr.mxu1 %v2070_v1 }
 0x4f5   : > { %1666 = vmatmul.mubr.msk.f32.vlgmr.msra.gmra.mrb[10].mxu1 %vm622_vm2, %v1826_v63 }
 0x4f6   : > { %1674 = vmatpush3.msra.mxu1 %v1215_v13  ;;  %1212 = vadd.xlane.f32.xlu0 %v1211_v14 }
 0x4f7   : > { %1675 = vmatprep.mubr.msk.f32.mxu1 %vm2069_vm0, %v2070_v1  ;;  %v1708_v1 = vpack.c.bf16 %v1300_v23, %v1299_v22 }
 0x4f9   : > { %1676 = vmatmul.mubr.msk.f32.vlgmr.msra.gmra.mrb[12].mxu1 %vm622_vm2, %v1830_v12  ;;  %1709 = vmatpush3.bf16.msra.mxu0 %v1708_v1 }
 0x4fa   : > { %706 = vadd.xlane.f32.xlu0 %v705_v15  ;;  %1710 = vmatprep.subr.bf16.mxu0 %v2068_v0 }
 0x4fd   : > { %1712 = vmatpush3.bf16.msra.mxu0 %v1711_v28 }
 0x516   : > { %v1042_v21 = vpop.xlane.xlu1 %1041 }
 0x57f   : > { %v870_v16 = vpop.xlane.xlu0 %869 }
 0x583   : > { %v1213_v17 = vpop.xlane.xlu0 %1212 }
 0x587   : > { %v707_v18 = vpop.xlane.xlu0 %706 }
 0x588   : > { %1831 = vrcp.f32 %v707_v18 }
 0x589   : > { %1833 = vrcp.f32 %v870_v16 }
 0x58a   : > { %1835 = vrcp.f32 %v1042_v21 }
 0x58b   : > { %1837 = vrcp.f32 %v1213_v17 }
 0x592   : > { %v1832_v19 = vpop.eup %1831 }
 0x593   : > { %v782_v20 = vmul.f32 %v1832_v19, %v777_v55  ;;  %v1834_v26 = vpop.eup %1833 }
 0x594   : > { %v1836_v31 = vpop.eup %1835 }
 0x595   : > { %783 = vst.msk [vmem:[#allocation2] sm:$0xff] %vm622_vm2, %v782_v20  ;;  %v1838_v35 = vpop.eup %1837 }
 0x5c4   : > { %v944_v27 = vpop.f32.mrb[8].mxu1 }
 0x5c5   : > { %v949_v29 = vmul.f32 %v1834_v26, %v944_v27  ;;  %v1657_v30 = vpop.f32.mrb[9].mxu1 }
 0x5c7   : > { %951 = vrot.lane.b32.xlu0 %v949_v29, %s2076_s10 }
 0x5c8   : > { %v1115_v32 = vpop.f32.mrb[10].mxu1 }
 0x5c9   : > { %v1120_v33 = vmul.f32 %v1836_v31, %v1115_v32  ;;  %v1667_v34 = vpop.f32.mrb[11].mxu1 }
 0x5cb   : > { %1122 = vrot.lane.b32.xlu1 %v1120_v33, %s2077_s19 }
 0x5cc   : > { %v1286_v36 = vpop.f32.mrb[12].mxu1 }
 0x5cd   : > { %v1291_v37 = vmul.f32 %v1838_v35, %v1286_v36  ;;  %v1677_v38 = vpop.f32.mrb[13].mxu1 }
 0x5cf   : > { %1293 = vrot.lane.b32.xlu0 %v1291_v37, %s2078_s16 }
 0x639   : > { %v952_v39 = vpop.permute.xlu0 %951 }
 0x63a   : > { %955 = vst.msk [vmem:[#allocation2] sm:$0xff] %vm954_vm3, %v952_v39 }
 0x63d   : > { %v1123_v0 = vpop.permute.xlu1 %1122 }
 0x63e   : > { %1126 = vst.msk [vmem:[#allocation2] sm:$0xff] %vm1125_vm4, %v1123_v0 }
 0x641   : > { %v1294_v40 = vpop.permute.xlu0 %1293 }
 0x642   : > { %1297 = vst.msk [vmem:[#allocation2] sm:$0xff] %vm1296_vm5, %v1294_v40 }
 0x649   : > { %v1298_v41 = vld [vmem:[#allocation2] sm:$0xff] }
 0x64a   : > { %1687 = vmatmul.mubr.msk.f32.vlgmr.msra.gmra.mrb[8].mxu0 %vm374_vm1, %v1298_v41 }
 0x71d   : > { %v1379_v43 = vpop.f32.mrb[8].mxu0 }
 0x71e   : > { %v1380_v44 = vadd.f32 %v1563_v42, %v1379_v43  ;;  %v1688_v45 = vpop.f32.mrb[9].mxu0 }
 0x720   : > { %1383 = vst.msk [vmem:[%s366_s3] sm:$0xff] %vm374_vm1, %v1380_v44 }
 0x721   : > { %1998 = shalt.err (!%p1995_p2)
}
 0x722   : > { %s1999_s26 = scalar_lea.hbm %s2458_s7, 128  ;;  %s2003_s18 = scalar_lea.hbm %s2509_s6, 256 }
 0x723   : > { %p2000_p5 = scmp.ne.s32.totalorder %s2458_s7, %s1999_s26  ;;  %p2004_p0 = scmp.lt.u32.totalorder %s2458_s7, %s2509_s6 }
 0x724   : > { %p2005_p7 = scmp.lt.u32.totalorder %s2003_s18, %s1999_s26  ;;  %p2007_p6 = scmp.lt.u32.totalorder %s1999_s26, %s2458_s7 }
 0x725   : > { %p2001_p12 = pnand %p2000_p5, %p2553_p10 }
 0x726   : > { %p2006_p1 = por %p2005_p7, %p2004_p0 }
 0x727   : > { %p2002_p3 = pneg %p2001_p12 }
 0x728   : > { %p2008_p8 = por %p2007_p6, %p2006_p1 }
 0x72a   : > { %p2009_p9 = pnand %p2008_p8, %p2002_p3 }
 0x72c   : > { %2012 = shalt.err (!%p2009_p9)
}
 0x72d   : > { %1727 = dma.vmem_to_hbm [thread:$0]  (%p2553_p10), %s2460_s11, 128, %s2458_s7, %s1385_s9  }
 0x72e PF: > { %s1410_s16 = sand.u32 1, %s2047_s21   ;;  %p2554_p11 = scmp.ne.s32.totalorder %s2529_s28, 0 }
 0x72f   : > { %p2555_p4 = scmp.ge.s32.totalorder %s2059_s24, 2  ;;  %s1411_s17 = scalar_lea.sflag [#allocation5], %s1410_s16 }
 0x731   : > { %p1747_p13 = pnand %p2555_p4, %p2554_p11 }
 0x733   : > { %2042 = dma.done.wait (!%p1747_p13), %s1411_s17, 128  }
 0x734   : > { %2044 = vsyncadd (!%p1747_p13), %s1411_s17, 4294967168  ;;  %s2556_s24 = sld [smem:[#allocation17_spill]]  ;;  %s2557_s20 = sld [smem:[#allocation18_spill]] }
 0x735   : > { %s2558_s21 = smov %s2051_s22  ;;  %s2559_s22 = smov %s2055_s23 }
 0x73a   : > { %p23_p2 = scmp.ge.s32.totalorder %s2556_s24, 4   ;;  %s2560_s23 = smov %s2557_s20 }
 0x73c   :  { %25 = sbr.rel (!%p23_p2) target bundleno = 11 (0xb), region = 121 }
 0x743   :  { %1416 = vsyncpa [#allocation4], 1 }
 0x744   :  { %1418 = vsyncpa [#allocation4 + $0x1], 1 }
 0x745   :  { %1419 = vsyncpa [#allocation7], 1 }
 0x746   :  { %1421 = vsyncpa [#allocation7 + $0x1], 1 }
 0x747   :  { %1422 = vsyncpa [#allocation10], 1 }
 0x748   :  { %1423 = vsyncpa [#allocation5], 1 }
 0x749   :  { %1425 = vsyncpa [#allocation5 + $0x1], 1 }

</bundles_post_ra>
